<compile_context>
chip_gen: v7x
topology: tpu7x:2x2x1
jax: 0.10.0
libtpu: 0.0.40
codegen_flags: <defaults>
</compile_context>

<pallas_src>
import functools

import jax
import jax.numpy as jnp
from jax.experimental import pallas as pl
from jax.experimental.pallas import tpu as pltpu

_LANES = 128
_SUBLANES = 8


def _focal_kernel(x0_ref, x1_ref, t_ref, out_ref, *, gamma, a0, a1, tile_rows):
    x0 = x0_ref[...].astype(jnp.float32)      # (tile_rows, 128) class-0 logits
    x1 = x1_ref[...].astype(jnp.float32)      # (tile_rows, 128) class-1 logits
    t = t_ref[...]                            # (tile_rows, 128) int32 targets, -1 = pad

    # C == 2 specialization of log_softmax + gather at the target class:
    #   logpt = x_t - logsumexp(x0, x1) = -softplus(x_other - x_t)
    d = jnp.where(t == 0, x1 - x0, x0 - x1)
    logpt = -(jnp.maximum(d, 0.0) + jnp.log1p(jnp.exp(-jnp.abs(d))))
    pt = jnp.exp(logpt)
    u = 1.0 - pt

    # (1 - pt) ** gamma: integer gamma -> repeated VPU multiply (no pow/EUP log+exp)
    g = float(gamma)
    if g.is_integer() and 0.0 <= g <= 16.0:
        gi = int(g)
        if gi == 0:
            focal = jnp.ones_like(u)
        else:
            focal = u
            for _ in range(gi - 1):
                focal = focal * u
    else:
        focal = u ** g

    # alpha gather -> where-select on the binary target (compile-time constants)
    at = jnp.where(t == 0, jnp.float32(a0), jnp.float32(a1))
    valid = (t >= 0).astype(jnp.float32)      # padded pixels contribute 0
    loss = -(focal * (logpt * at)) * valid    # (tile_rows, 128)

    # per-tile partial sum kept as a lane-dense (8, 128) slab (pure VPU adds)
    part = loss.reshape(tile_rows // _SUBLANES, _SUBLANES, _LANES).sum(axis=0)
    out_ref[...] = part[None]                 # (1, 8, 128)


def binary_focal_weighted_loss(logits, target, *, gamma=2, alpha=None,
                               size_average=True, tile_rows=1024):
    """Forward pass of BinaryFocalWeightedLoss using a Pallas TPU kernel."""
    # --- class-major planes (no (M, C) transpose) -----------------------------
    if logits.ndim > 2:
        n, c = logits.shape[0], logits.shape[1]
        planes = logits.reshape(n, c, -1)       # (N, C, H*W), contiguous slices
        x0 = planes[:, 0, :].reshape(-1)        # (M,) in the same (n, hw) row order
        x1 = planes[:, 1, :].reshape(-1)        #        as torch's view/transpose
    else:
        c = logits.shape[1]
        x0 = logits[:, 0]
        x1 = logits[:, 1]
    assert c == 2, "binary kernel: number of classes must be 2"
    # TODO(synk): general C>2 multi-class path is not implemented in this
    # binary-specialized kernel (the module's binary use-case).

    t = target.reshape(-1).astype(jnp.int32)    # (M,)
    m = x0.shape[0]
    assert t.shape[0] == m

    # --- alpha semantics (same as torch __init__), baked as constants ---------
    if alpha is None:
        a0, a1 = 1.0, 1.0
    elif isinstance(alpha, (float, int)):
        a0, a1 = float(alpha), 1.0 - float(alpha)
    else:
        a_list = list(alpha)
        assert len(a_list) == 2, "alpha list must have length 2 (binary)"
        a0, a1 = float(a_list[0]), float(a_list[1])

    # --- lane-dense tiling: (rows, 128), rows padded to a tile multiple -------
    total_rows = (m + _LANES - 1) // _LANES
    tile_rows = max(_SUBLANES,
                    min(tile_rows,
                        ((total_rows + _SUBLANES - 1) // _SUBLANES) * _SUBLANES))
    rows_pad = ((total_rows + tile_rows - 1) // tile_rows) * tile_rows
    num_tiles = rows_pad // tile_rows
    m_pad = rows_pad * _LANES

    pad = m_pad - m
    x0 = jnp.pad(x0, (0, pad)).reshape(rows_pad, _LANES)
    x1 = jnp.pad(x1, (0, pad)).reshape(rows_pad, _LANES)
    t = jnp.pad(t, (0, pad), constant_values=-1).reshape(rows_pad, _LANES)

    kernel = functools.partial(_focal_kernel, gamma=gamma, a0=a0, a1=a1,
                               tile_rows=tile_rows)

    partials = pl.pallas_call(
        kernel,
        out_shape=jax.ShapeDtypeStruct((num_tiles, _SUBLANES, _LANES), jnp.float32),
        grid_spec=pltpu.PrefetchScalarGridSpec(
            num_scalar_prefetch=0,
            grid=(num_tiles,),
            in_specs=[
                pl.BlockSpec((tile_rows, _LANES), lambda i: (i, 0)),
                pl.BlockSpec((tile_rows, _LANES), lambda i: (i, 0)),
                pl.BlockSpec((tile_rows, _LANES), lambda i: (i, 0)),
            ],
            out_specs=pl.BlockSpec((1, _SUBLANES, _LANES), lambda i: (i, 0, 0)),
        ),
        compiler_params=pltpu.CompilerParams(
            dimension_semantics=("parallel",)),
    )(x0, x1, t)

    total = jnp.sum(partials)
    if size_average:
        return total / jnp.float32(m)
    return total


def _reference(logits, target, gamma=2, alpha=None, size_average=True):
    """Pure-JAX reference mirroring the PyTorch module."""
    x = logits
    if x.ndim > 2:
        n, c = x.shape[0], x.shape[1]
        x = jnp.transpose(x.reshape(n, c, -1), (0, 2, 1)).reshape(-1, c)
    t = target.reshape(-1).astype(jnp.int32)
    logp = jax.nn.log_softmax(x, axis=1)
    logpt = jnp.take_along_axis(logp, t[:, None], axis=1)[:, 0]
    pt = jnp.exp(logpt)
    if alpha is not None:
        if isinstance(alpha, (float, int)):
            a = jnp.array([float(alpha), 1.0 - float(alpha)], dtype=jnp.float32)
        else:
            a = jnp.asarray(alpha, dtype=jnp.float32)
        logpt = logpt * a[t]
    loss = -1.0 * (1.0 - pt) ** gamma * logpt
    return jnp.mean(loss) if size_average else jnp.sum(loss)


if __name__ == "__main__":
    key = jax.random.PRNGKey(0)
    kx, kt = jax.random.split(key)

    # binary classification, NCHW conv-style logits
    N, C, H, W = 2, 2, 16, 16
    logits = jax.random.normal(kx, (N, C, H, W), dtype=jnp.float32)
    target = jax.random.randint(kt, (N, H, W), 0, C, dtype=jnp.int32)

    # case 1: scalar alpha -> [alpha, 1-alpha], mean reduction
    out = binary_focal_weighted_loss(logits, target, gamma=2, alpha=0.25,
                                     size_average=True)
    out = jax.block_until_ready(out)
    ref = _reference(logits, target, gamma=2, alpha=0.25, size_average=True)
    assert jnp.allclose(out, ref, rtol=1e-5, atol=1e-6), (out, ref)

    # case 2: list alpha, sum reduction
    out2 = binary_focal_weighted_loss(logits, target, gamma=2, alpha=[0.3, 0.7],
                                      size_average=False)
    out2 = jax.block_until_ready(out2)
    ref2 = _reference(logits, target, gamma=2, alpha=[0.3, 0.7],
                      size_average=False)
    assert jnp.allclose(out2, ref2, rtol=1e-5, atol=1e-5), (out2, ref2)

    print("KERNEL_OK")
</pallas_src>

<mosaic_0001>
module attributes {stable_mosaic.version = 11 : i64} {
  func.func @_focal_kernel(%arg0: i32, %arg1: memref<8x128xf32, #tpu.memory_space<vmem>>, %arg2: memref<8x128xf32, #tpu.memory_space<vmem>>, %arg3: memref<8x128xi32, #tpu.memory_space<vmem>>, %arg4: memref<1x8x128xf32, #tpu.memory_space<vmem>>) attributes {dimension_semantics = [#tpu.dimension_semantics<parallel>], iteration_bounds = array<i64: 1>, scalar_prefetch = 0 : i64, scratch_operands = 0 : i64, tpu.core_type = #tpu.core_type<tc>, window_params = [{transform_indices = @transform_0, window_bounds = array<i64: 8, 128>}, {transform_indices = @transform_1, window_bounds = array<i64: 8, 128>}, {transform_indices = @transform_2, window_bounds = array<i64: 8, 128>}, {transform_indices = @transform_3, window_bounds = array<i64: 1, 8, 128>}]} {
    %c0 = arith.constant 0 : index
    %c0_0 = arith.constant 0 : index
    %0 = vector.load %arg1[%c0, %c0_0] : memref<8x128xf32, #tpu.memory_space<vmem>>, vector<8x128xf32>
    %c0_1 = arith.constant 0 : index
    %c0_2 = arith.constant 0 : index
    %1 = vector.load %arg2[%c0_1, %c0_2] : memref<8x128xf32, #tpu.memory_space<vmem>>, vector<8x128xf32>
    %c0_3 = arith.constant 0 : index
    %c0_4 = arith.constant 0 : index
    %2 = vector.load %arg3[%c0_3, %c0_4] : memref<8x128xi32, #tpu.memory_space<vmem>>, vector<8x128xi32>
    %c0_i32 = arith.constant 0 : i32
    %3 = vector.broadcast %c0_i32 : i32 to vector<8x128xi32>
    %4 = arith.cmpi eq, %2, %3 : vector<8x128xi32>
    %5 = arith.subf %1, %0 : vector<8x128xf32>
    %6 = arith.subf %0, %1 : vector<8x128xf32>
    %7 = arith.select %4, %5, %6 : vector<8x128xi1>, vector<8x128xf32>
    %cst = arith.constant 0.000000e+00 : f32
    %8 = vector.broadcast %cst : f32 to vector<8x128xf32>
    %9 = arith.maximumf %7, %8 : vector<8x128xf32>
    %10 = math.absf %7 : vector<8x128xf32>
    %cst_5 = arith.constant 0.000000e+00 : f32
    %11 = vector.broadcast %cst_5 : f32 to vector<8x128xf32>
    %12 = arith.subf %11, %10 : vector<8x128xf32>
    %13 = math.exp %12 : vector<8x128xf32>
    %14 = math.log1p %13 : vector<8x128xf32>
    %15 = arith.addf %9, %14 : vector<8x128xf32>
    %cst_6 = arith.constant 0.000000e+00 : f32
    %16 = vector.broadcast %cst_6 : f32 to vector<8x128xf32>
    %17 = arith.subf %16, %15 : vector<8x128xf32>
    %18 = math.exp %17 : vector<8x128xf32>
    %cst_7 = arith.constant 1.000000e+00 : f32
    %19 = vector.broadcast %cst_7 : f32 to vector<8x128xf32>
    %20 = arith.subf %19, %18 : vector<8x128xf32>
    %21 = arith.mulf %20, %20 : vector<8x128xf32>
    %c0_i32_8 = arith.constant 0 : i32
    %22 = vector.broadcast %c0_i32_8 : i32 to vector<8x128xi32>
    %23 = arith.cmpi eq, %2, %22 : vector<8x128xi32>
    %cst_9 = arith.constant 2.500000e-01 : f32
    %cst_10 = arith.constant 7.500000e-01 : f32
    %24 = vector.broadcast %cst_9 : f32 to vector<8x128xf32>
    %25 = vector.broadcast %cst_10 : f32 to vector<8x128xf32>
    %26 = arith.select %23, %24, %25 : vector<8x128xi1>, vector<8x128xf32>
    %c0_i32_11 = arith.constant 0 : i32
    %27 = vector.broadcast %c0_i32_11 : i32 to vector<8x128xi32>
    %28 = arith.cmpi sge, %2, %27 : vector<8x128xi32>
    %29 = arith.extui %28 : vector<8x128xi1> to vector<8x128xi32>
    %30 = arith.sitofp %29 : vector<8x128xi32> to vector<8x128xf32>
    %31 = arith.mulf %17, %26 : vector<8x128xf32>
    %32 = arith.mulf %21, %31 : vector<8x128xf32>
    %cst_12 = arith.constant 0.000000e+00 : f32
    %33 = vector.broadcast %cst_12 : f32 to vector<8x128xf32>
    %34 = arith.subf %33, %32 : vector<8x128xf32>
    %35 = arith.mulf %34, %30 : vector<8x128xf32>
    %36 = vector.shape_cast %35 : vector<8x128xf32> to vector<1x8x128xf32>
    %cst_13 = arith.constant dense<0.000000e+00> : vector<8x128xf32>
    %37 = vector.multi_reduction <add>, %36, %cst_13 [0] : vector<1x8x128xf32> to vector<8x128xf32>
    %38 = vector.shape_cast %37 : vector<8x128xf32> to vector<1x8x128xf32>
    %c0_14 = arith.constant 0 : index
    %c0_15 = arith.constant 0 : index
    %c0_16 = arith.constant 0 : index
    %39 = vector.load %arg4[%c0_14, %c0_15, %c0_16] : memref<1x8x128xf32, #tpu.memory_space<vmem>>, vector<1x8x128xf32>
    tpu.vector_store %arg4[%c0_14, %c0_15, %c0_16], %38 {strides = array<i32>} : memref<1x8x128xf32, #tpu.memory_space<vmem>>, vector<1x8x128xf32>,
    return
  }
  func.func @transform_0(%arg0: i32) -> (i32, i32) {
    %c0_i32 = arith.constant 0 : i32
    %c0_i32_0 = arith.constant 0 : i32
    return %arg0, %c0_i32 : i32, i32
  }
  func.func @transform_1(%arg0: i32) -> (i32, i32) {
    %c0_i32 = arith.constant 0 : i32
    %c0_i32_0 = arith.constant 0 : i32
    return %arg0, %c0_i32 : i32, i32
  }
  func.func @transform_2(%arg0: i32) -> (i32, i32) {
    %c0_i32 = arith.constant 0 : i32
    %c0_i32_0 = arith.constant 0 : i32
    return %arg0, %c0_i32 : i32, i32
  }
  func.func @transform_3(%arg0: i32) -> (i32, i32, i32) {
    %c0_i32 = arith.constant 0 : i32
    %c0_i32_0 = arith.constant 0 : i32
    %c0_i32_1 = arith.constant 0 : i32
    return %arg0, %c0_i32, %c0_i32_0 : i32, i32, i32
  }
}

</mosaic_0001>

<bundles_post_ra>
// kernel: tpu_custom_call.1
= control target key start
LH: loop header
LB: loop body
LE: loop exit
PB: predicated region body
PF: predicated region fallthrough
CT: control target
= control target key end

     0   :  { %8 = vsyncpa [#allocation3], 0  ;;  %s286_s0 = inlined_call_operand.hbm [shape: f32[8,128], index: 0, kind: input, shape index: {}]   ;;  %s287_s1 = inlined_call_operand.hbm [shape: f32[8,128], index: 1, kind: input, shape index: {}]   ;;  %s288_s2 = inlined_call_operand.hbm [shape: s32[8,128], index: 2, kind: input, shape index: {}]   ;;  %s289_s3 = inlined_call_operand.hbm [shape: f32[1,8,128], index: 3, kind: output, shape index: {}]  }
   0x1   :  { %9 = vsyncpa [#allocation6], 0 }
   0x2   :  { %10 = vsyncpa [#allocation4], 0  ;;  %s210_s12 = smov [#allocation5]   ;;  %s211_s14 = smov [#allocation2]  }
   0x3   :  { %s27_s13 = sshll.u32 %s210_s12, 4  ;;  %s17_s15 = sshll.u32 %s211_s14, 4  ;;  %s28_s13 = int_to_ptr.vmem [resolvable:$true] %s27_s13  ;;  %s18_s15 = int_to_ptr.vmem [resolvable:$true] %s17_s15 }
   0x4   :  { %s116_s18 = scalar_lea.hbm %s287_s1, 128 }
   0x5   :  { %p117_p0 = scmp.ne.s32.totalorder %s287_s1, %s116_s18  ;;  %p120_p1 = scmp.lt.u32.totalorder %s116_s18, %s287_s1 }
   0x7   :  { %p122_p2 = pnand %p120_p1, %p117_p0 }
   0x9   :  { %125 = shalt.err (!%p122_p2)
}
   0xa   :  { %s126_s23 = scalar_lea.vmem %s28_s13, 128  ;;  %p131_p4 = scmp.lt.s32.totalorder %s28_s13, %s28_s13 }
   0xb   :  { %p127_p3 = scmp.ne.s32.totalorder %s28_s13, %s126_s23  ;;  %p132_p5 = scmp.lt.s32.totalorder %s126_s23, %s126_s23 }
   0xd   :  { %p133_p6 = por %p132_p5, %p131_p4 }
   0xf   :  { %p134_p7 = pnand %p133_p6, %p127_p3 }
  0x11   :  { %137 = shalt.err (!%p134_p7)
}
  0x12   :  { %30 = dma.hbm_to_vmem [thread:$0]  %s287_s1, 128, %s28_s13, [#allocation6]  }
  0x13   :  { %s138_s28 = scalar_lea.hbm %s286_s0, 128 }
  0x14   :  { %p139_p8 = scmp.ne.s32.totalorder %s286_s0, %s138_s28  ;;  %p142_p9 = scmp.lt.u32.totalorder %s138_s28, %s286_s0 }
  0x16   :  { %p144_p10 = pnand %p142_p9, %p139_p8 }
  0x18   :  { %147 = shalt.err (!%p144_p10)
}
  0x19   :  { %s148_s6 = scalar_lea.vmem %s18_s15, 128  ;;  %p153_p12 = scmp.lt.s32.totalorder %s18_s15, %s18_s15 }
  0x1a   :  { %p149_p11 = scmp.ne.s32.totalorder %s18_s15, %s148_s6  ;;  %p154_p13 = scmp.lt.s32.totalorder %s148_s6, %s148_s6 }
  0x1c   :  { %p155_p0 = por %p154_p13, %p153_p12 }
  0x1e   :  { %p156_p1 = pnand %p155_p0, %p149_p11 }
  0x20   :  { %159 = shalt.err (!%p156_p1)
}
  0x21   :  { %20 = dma.hbm_to_vmem [thread:$0]  %s286_s0, 128, %s18_s15, [#allocation3]  }
  0x22   :  { %s212_s8 = smov [#allocation7]   ;;  %s160_s12 = scalar_lea.hbm %s288_s2, 128 }
  0x23   :  { %s37_s9 = sshll.u32 %s212_s8, 4  ;;  %p161_p2 = scmp.ne.s32.totalorder %s288_s2, %s160_s12  ;;  %s38_s9 = int_to_ptr.vmem [resolvable:$true] %s37_s9 }
  0x24   :  { %p164_p3 = scmp.lt.u32.totalorder %s160_s12, %s288_s2 }
  0x26   :  { %p166_p4 = pnand %p164_p3, %p161_p2 }
  0x28   :  { %169 = shalt.err (!%p166_p4)
}
  0x29   :  { %s170_s18 = scalar_lea.vmem %s38_s9, 128  ;;  %p175_p6 = scmp.lt.s32.totalorder %s38_s9, %s38_s9 }
  0x2a   :  { %p171_p5 = scmp.ne.s32.totalorder %s38_s9, %s170_s18  ;;  %p176_p7 = scmp.lt.s32.totalorder %s170_s18, %s170_s18 }
  0x2c   :  { %p177_p8 = por %p176_p7, %p175_p6 }
  0x2e   :  { %p178_p9 = pnand %p177_p8, %p171_p5 }
  0x30   :  { %181 = shalt.err (!%p178_p9)
}
  0x31   :  { %40 = dma.hbm_to_vmem [thread:$0]  %s288_s2, 128, %s38_s9, [#allocation6]  }
  0x32   :  { %204 = dma.done.wait [#allocation3], 128  }
  0x33   :  { %205 = vsyncadd [#allocation3], 4294967168 }
  0x34   :  { %206 = dma.done.wait [#allocation6], 256  }
  0x35   :  { %207 = vsyncadd [#allocation6], 4294967040  ;;  %v50_v0 = vld [vmem:[#allocation2] sm:$0xff]  ;;  %v51_v1 = vld [vmem:[#allocation5] sm:$0xff]  ;;  %v213_v22 = vmov 0.75   ;;  %v214_v29 = vmov 0.0  }
  0x36   :  { %v52_v2 = vld [vmem:[#allocation7] sm:$0xff]  ;;  %v54_v3 = vsub.f32 %v51_v1, %v50_v0  ;;  %v55_v4 = vsub.f32 %v50_v0, %v51_v1  ;;  %s215_s2 = smov [#allocation8]  }
  0x37   :  { %vm53_vm0 = vcmp.eq.s32.totalorder %v52_v2, 0  ;;  %vm78_vm2 = vcmp.ge.s32.totalorder %v52_v2, 0  ;;  %s93_s19 = sshll.u32 %s215_s2, 4  ;;  %s94_s19 = int_to_ptr.vmem [resolvable:$true] %s93_s19 }
  0x38   :  { %v56_v5 = vsel %vm53_vm0, %v54_v3, %v55_v4  ;;  %v77_v23 = vsel %vm53_vm0, 0.25, %v213_v22  ;;  %v103_v30 = vsel %vm78_vm2, 1.0, %v214_v29  ;;  %s182_s20 = scalar_lea.vmem %s94_s19, 128  ;;  %p187_p11 = scmp.lt.s32.totalorder %s94_s19, %s94_s19 }
  0x39   :  { %v58_v6 = vand.u32 2147483647, %v56_v5  ;;  %v57_v16 = vmax.f32 %v56_v5, 0.0  ;;  %p183_p10 = scmp.ne.s32.totalorder %s94_s19, %s182_s20  ;;  %p188_p12 = scmp.lt.s32.totalorder %s182_s20, %s182_s20 }
  0x3b   :  { %v59_v7 = vsub.f32 0.0, %v58_v6  ;;  %p189_p13 = por %p188_p12, %p187_p11 }
  0x3d   :  { %v60_v8 = vmul.f32 1.442695, %v59_v7  ;;  %p190_p0 = pnand %p189_p13, %p183_p10 }
  0x3f   :  { %110 = vpow2.f32 %v60_v8 }
  0x49   :  { %v111_v9 = vpop.eup %110 }
  0x4a   :  { %v62_v10 = vadd.f32 1.0, %v111_v9  ;;  %v65_v11 = vmul.f32 -0.5, %v111_v9  ;;  %v68_v13 = vand.u32 2147483647, %v111_v9 }
  0x4c   :  { %112 = vlog2.f32 %v62_v10  ;;  %v66_v12 = vadd.f32 1.0, %v65_v11  ;;  %vm69_vm1 = vcmp.lt.f32.partialorder %v68_v13, 0.0004427343 }
  0x4e   :  { %v67_v14 = vmul.f32 %v111_v9, %v66_v12 }
  0x56   :  { %v113_v15 = vpop.eup %112 }
  0x57   :  { %v64_v17 = vmul.f32 0.6931472, %v113_v15 }
  0x59   :  { %v70_v18 = vsel %vm69_vm1, %v67_v14, %v64_v17 }
  0x5a   :  { %v71_v19 = vadd.f32 %v70_v18, %v57_v16 }
  0x5c   :  { %v72_v20 = vsub.f32 0.0, %v71_v19 }
  0x5e   :  { %v73_v21 = vmul.f32 1.442695, %v72_v20  ;;  %v81_v26 = vmul.f32 %v77_v23, %v72_v20 }
  0x60   :  { %114 = vpow2.f32 %v73_v21 }
  0x6a   :  { %v115_v24 = vpop.eup %114 }
  0x6b   :  { %v75_v25 = vsub.f32 1.0, %v115_v24 }
  0x6d   :  { %v76_v27 = vmul.f32 %v75_v25, %v75_v25 }
  0x6f   :  { %v82_v28 = vmul.f32 %v81_v26, %v76_v27 }
  0x71   :  { %v83_v31 = vsub.f32 0.0, %v82_v28 }
  0x73   :  { %v84_v32 = vmul.f32 %v103_v30, %v83_v31 }
  0x75   :  { %86 = vst [vmem:[#allocation8] sm:$0xff] %v84_v32 }
  0x76   :  { %193 = shalt.err (!%p190_p0)
}
  0x77   :  { %s194_s23 = scalar_lea.hbm %s289_s3, 128 }
  0x78   :  { %p195_p1 = scmp.ne.s32.totalorder %s289_s3, %s194_s23  ;;  %p198_p2 = scmp.lt.u32.totalorder %s194_s23, %s289_s3 }
  0x7a   :  { %p200_p3 = pnand %p198_p2, %p195_p1 }
  0x7c   :  { %203 = shalt.err (!%p200_p3)
}
  0x7d   :  { %96 = dma.vmem_to_hbm [thread:$0]  %s94_s19, 128, %s289_s3, [#allocation4]  }
  0x7e   :  { %208 = dma.done.wait [#allocation4], 128  }
  0x7f   :  { %209 = vsyncadd [#allocation4], 4294967168 }
  0x80   :  { %100 = vsyncpa [#allocation3], 1 }
  0x81   :  { %101 = vsyncpa [#allocation6], 1 }
  0x82   :  { %102 = vsyncpa [#allocation4], 1 }

</bundles_post_ra>
